<compile_context>
chip_gen: v7x
topology: tpu7x:2x2x1
jax: 0.10.0
libtpu: 0.0.40
codegen_flags: <defaults>
</compile_context>

<pallas_src>
import jax
import jax.numpy as jnp
import numpy as np
from jax.experimental import pallas as pl
from jax.experimental.pallas import tpu as pltpu


def build_grid(resolution):
    """NumPy port of the PyTorch helper (identical math)."""
    ranges = [np.linspace(0.0, 1.0, num=res) for res in resolution]
    grid = np.meshgrid(*ranges, sparse=False, indexing="ij")
    grid = np.stack(grid, axis=-1)
    grid = np.reshape(grid, [resolution[0], resolution[1], -1])
    grid = np.expand_dims(grid, axis=0)
    grid = grid.astype(np.float32)
    return np.concatenate([grid, 1.0 - grid], axis=-1)  # (1, H, W, 4)


def _make_kernel(T: int):
    """Kernel factory closing over the (static) spatial tile size T."""

    def kernel(x_ref, g_ref, w_ref, b_ref, o_ref, pos_ref):
        # x_ref : (Bt, C, T) activations for this (spatial tile, batch block)
        # g_ref : (4, HWp)   full resident positional grid (features x spatial)
        # w_ref : (C, 4)     nn.Linear weight (hidden, in_features)
        # b_ref : (C, 1)     nn.Linear bias
        # o_ref : (Bt, C, T) output
        # pos_ref: (C, T)    f32 scratch, positional embedding for this tile
        ti = pl.program_id(0)
        bi = pl.program_id(1)

        # Compute pos only once per spatial tile (batch axis is inner /
        # "arbitrary"); remaining batch iterations reuse the scratch.
        @pl.when(bi == 0)
        def _():
            start = pl.multiple_of(ti * T, 128)
            g = g_ref[:, pl.ds(start, T)]          # (4, T) f32
            w = w_ref[...]                          # (C, 4) f32
            pos = b_ref[...] + w[:, 0:1] * g[0:1, :]   # (C, T)
            for k in range(1, 4):
                pos = pos + w[:, k:k + 1] * g[k:k + 1, :]
            pos_ref[...] = pos

        # Hot path: lane-dense load + add + store; f32 accumulate, single cast.
        o_ref[...] = (
            x_ref[...].astype(jnp.float32) + pos_ref[...][None, :, :]
        ).astype(o_ref.dtype)

    return kernel


def _pick_tiles(B: int, C: int, HWp: int, block_budget_bytes: int = 2 << 20):
    """Byte-budgeted tiling: spatial tile T (multiple of 128 dividing HWp) and
    batch fold Bt (divisor of B) so each x block is ~block_budget_bytes."""
    itemsize = 4  # budget for the f32 worst case
    max_lanes = block_budget_bytes // (C * itemsize)
    max_lanes = max(512, min(8192, max_lanes))
    max_lanes = (max_lanes // 128) * 128
    T = min(max_lanes, HWp)
    while HWp % T != 0:          # terminates at T=128 (HWp is a 128-multiple)
        T -= 128
    n_tiles = HWp // T

    Bt = 1
    for cand in range(B, 0, -1):  # largest divisor of B within the budget
        if B % cand == 0 and cand * C * T * itemsize <= block_budget_bytes:
            Bt = cand
            break
    n_bblocks = B // Bt
    return T, n_tiles, Bt, n_bblocks


@jax.jit
def soft_position_embed(inputs_nchw, weight, bias, grid_t):
    """inputs_nchw: (B, C, H, W); weight: (C, 4); bias: (C,); grid_t: (4, H*W)."""
    B, C, H, W = inputs_nchw.shape
    HW = H * W
    HWp = ((HW + 127) // 128) * 128        # pad spatial axis to a 128 multiple
    T, n_tiles, Bt, n_bblocks = _pick_tiles(B, C, HWp)

    # Free contiguous reshape (no activation transpose), then pad spatial axis.
    x = inputs_nchw.reshape(B, C, HW)
    if HWp != HW:
        x = jnp.pad(x, ((0, 0), (0, 0), (0, HWp - HW)))
    g = grid_t.astype(jnp.float32)
    if HWp != HW:
        g = jnp.pad(g, ((0, 0), (0, HWp - HW)))
    w = weight.astype(jnp.float32)
    b = bias.reshape(C, 1).astype(jnp.float32)

    # VMEM budget: double-buffered in+out blocks + resident grid + scratch.
    est = (2 * 2 * Bt * C * T * 4) + (4 * HWp * 4) + (C * T * 4) + (C * 4 * 4) + (C * 4)
    vmem_limit = int(min(max(2 * est, 28 << 20), 48 << 20))  # v7x(64 MiB)-safe

    kernel = _make_kernel(T)
    out = pl.pallas_call(
        kernel,
        out_shape=jax.ShapeDtypeStruct((B, C, HWp), inputs_nchw.dtype),
        grid_spec=pltpu.PrefetchScalarGridSpec(
            num_scalar_prefetch=0,
            grid=(n_tiles, n_bblocks),           # batch inner -> pos reuse
            in_specs=[
                pl.BlockSpec((Bt, C, T), lambda ti, bi: (bi, 0, ti)),
                pl.BlockSpec((4, HWp), lambda ti, bi: (0, 0)),   # resident
                pl.BlockSpec((C, 4), lambda ti, bi: (0, 0)),
                pl.BlockSpec((C, 1), lambda ti, bi: (0, 0)),
            ],
            out_specs=pl.BlockSpec((Bt, C, T), lambda ti, bi: (bi, 0, ti)),
            scratch_shapes=[pltpu.VMEM((C, T), jnp.float32)],
        ),
        compiler_params=pltpu.CompilerParams(
            # TODO(synk): on v7x, pltpu.CORE_PARALLEL on the spatial axis would
            # force sharding across both TensorCores; kept "parallel" for
            # portability across v5e/v6e/v7x.
            dimension_semantics=(pltpu.PARALLEL, pltpu.ARBITRARY),
            vmem_limit_bytes=vmem_limit,
        ),
    )(x, g, w, b)

    if HWp != HW:
        out = out[:, :, :HW]
    return out.reshape(B, C, H, W)


if __name__ == "__main__":
    # Small shapes consistent with the module's forward.
    B = 2
    in_features = 4
    hidden_size = 32
    resolution = (16, 16)
    H, W = resolution

    key = jax.random.PRNGKey(0)
    k_x, k_w, k_b = jax.random.split(key, 3)

    # Deterministic parameter init (nn.Linear(in_features, hidden_size) shapes).
    bound = 1.0 / np.sqrt(in_features)
    weight = jax.random.uniform(
        k_w, (hidden_size, in_features), jnp.float32, -bound, bound
    )
    bias = jax.random.uniform(k_b, (hidden_size,), jnp.float32, -bound, bound)

    # Fixed positional grid (non-learnable buffer); transposed once on host.
    grid_np = build_grid(resolution)                      # (1, H, W, 4)
    grid_hw4 = grid_np[0]                                 # (H, W, 4) numpy
    grid_t = jnp.asarray(
        np.ascontiguousarray(grid_hw4.reshape(H * W, 4).T)
    )                                                     # (4, H*W)

    # Inputs are NCHW, channels == hidden_size.
    x = jax.random.normal(k_x, (B, hidden_size, H, W), jnp.float32)

    out = soft_position_embed(x, weight, bias, grid_t)
    out = jax.block_until_ready(out)

    # Pure-JAX reference check.
    pos_ref = (
        jnp.einsum("hwk,ck->chw", jnp.asarray(grid_hw4), weight)
        + bias[:, None, None]
    )
    ref = x + pos_ref[None]
    np.testing.assert_allclose(np.asarray(out), np.asarray(ref), rtol=1e-5, atol=1e-5)

    print("KERNEL_OK")
</pallas_src>

<mosaic_0001>
module attributes {stable_mosaic.version = 11 : i64} {
  func.func @kernel(%arg0: i32, %arg1: i32, %arg2: memref<2x32x256xf32, #tpu.memory_space<vmem>>, %arg3: memref<4x256xf32, #tpu.memory_space<vmem>>, %arg4: memref<32x4xf32, #tpu.memory_space<vmem>>, %arg5: memref<32x1xf32, #tpu.memory_space<vmem>>, %arg6: memref<2x32x256xf32, #tpu.memory_space<vmem>>, %arg7: memref<32x256xf32, #tpu.memory_space<vmem>>) attributes {dimension_semantics = [#tpu.dimension_semantics<parallel>, #tpu.dimension_semantics<arbitrary>], iteration_bounds = array<i64: 1, 1>, scalar_prefetch = 0 : i64, scratch_operands = 1 : i64, tpu.core_type = #tpu.core_type<tc>, window_params = [{transform_indices = @transform_0, window_bounds = array<i64: 2, 32, 256>}, {pipeline_mode = #tpu.pipeline_mode<synchronous>, transform_indices = @transform_1, window_bounds = array<i64: 4, 256>}, {pipeline_mode = #tpu.pipeline_mode<synchronous>, transform_indices = @transform_2, window_bounds = array<i64: 32, 4>}, {pipeline_mode = #tpu.pipeline_mode<synchronous>, transform_indices = @transform_3, window_bounds = array<i64: 32, 1>}, {transform_indices = @transform_4, window_bounds = array<i64: 2, 32, 256>}]} {
    %c0_i32 = arith.constant 0 : i32
    %0 = arith.cmpi eq, %arg1, %c0_i32 : i32
    %1 = arith.extui %0 : i1 to i32
    %c0_i32_0 = arith.constant 0 : i32
    %2 = arith.cmpi ne, %1, %c0_i32_0 : i32
    scf.if %2 {
      %c256_i32 = arith.constant 256 : i32
      %9 = arith.muli %arg0, %c256_i32 : i32
      %10 = tpu.assume_multiple %9, 128 : i32
      %c0_8 = arith.constant 0 : index
      %11 = arith.index_cast %10 : i32 to index
      %12 = vector.load %arg3[%c0_8, %11] : memref<4x256xf32, #tpu.memory_space<vmem>>, vector<4x256xf32>
      %c0_9 = arith.constant 0 : index
      %c0_10 = arith.constant 0 : index
      %13 = vector.load %arg4[%c0_9, %c0_10] : memref<32x4xf32, #tpu.memory_space<vmem>>, vector<32x4xf32>
      %c0_11 = arith.constant 0 : index
      %c0_12 = arith.constant 0 : index
      %14 = vector.load %arg5[%c0_11, %c0_12] : memref<32x1xf32, #tpu.memory_space<vmem>>, vector<32x1xf32>
      %15 = vector.extract_strided_slice %13 {offsets = [0, 0], sizes = [32, 1], strides = [1, 1]} : vector<32x4xf32> to vector<32x1xf32>
      %16 = vector.extract_strided_slice %12 {offsets = [0, 0], sizes = [1, 256], strides = [1, 1]} : vector<4x256xf32> to vector<1x256xf32>
      %17 = vector.broadcast %15 : vector<32x1xf32> to vector<32x256xf32>
      %18 = vector.broadcast %16 : vector<1x256xf32> to vector<32x256xf32>
      %19 = arith.mulf %17, %18 : vector<32x256xf32>
      %20 = vector.broadcast %14 : vector<32x1xf32> to vector<32x256xf32>
      %21 = arith.addf %20, %19 : vector<32x256xf32>
      %22 = vector.extract_strided_slice %13 {offsets = [0, 1], sizes = [32, 1], strides = [1, 1]} : vector<32x4xf32> to vector<32x1xf32>
      %23 = vector.extract_strided_slice %12 {offsets = [1, 0], sizes = [1, 256], strides = [1, 1]} : vector<4x256xf32> to vector<1x256xf32>
      %24 = vector.broadcast %22 : vector<32x1xf32> to vector<32x256xf32>
      %25 = vector.broadcast %23 : vector<1x256xf32> to vector<32x256xf32>
      %26 = arith.mulf %24, %25 : vector<32x256xf32>
      %27 = arith.addf %21, %26 : vector<32x256xf32>
      %28 = vector.extract_strided_slice %13 {offsets = [0, 2], sizes = [32, 1], strides = [1, 1]} : vector<32x4xf32> to vector<32x1xf32>
      %29 = vector.extract_strided_slice %12 {offsets = [2, 0], sizes = [1, 256], strides = [1, 1]} : vector<4x256xf32> to vector<1x256xf32>
      %30 = vector.broadcast %28 : vector<32x1xf32> to vector<32x256xf32>
      %31 = vector.broadcast %29 : vector<1x256xf32> to vector<32x256xf32>
      %32 = arith.mulf %30, %31 : vector<32x256xf32>
      %33 = arith.addf %27, %32 : vector<32x256xf32>
      %34 = vector.extract_strided_slice %13 {offsets = [0, 3], sizes = [32, 1], strides = [1, 1]} : vector<32x4xf32> to vector<32x1xf32>
      %35 = vector.extract_strided_slice %12 {offsets = [3, 0], sizes = [1, 256], strides = [1, 1]} : vector<4x256xf32> to vector<1x256xf32>
      %36 = vector.broadcast %34 : vector<32x1xf32> to vector<32x256xf32>
      %37 = vector.broadcast %35 : vector<1x256xf32> to vector<32x256xf32>
      %38 = arith.mulf %36, %37 : vector<32x256xf32>
      %39 = arith.addf %33, %38 : vector<32x256xf32>
      %c0_13 = arith.constant 0 : index
      %c0_14 = arith.constant 0 : index
      %40 = vector.load %arg7[%c0_13, %c0_14] : memref<32x256xf32, #tpu.memory_space<vmem>>, vector<32x256xf32>
      tpu.vector_store %arg7[%c0_13, %c0_14], %39 {strides = array<i32>} : memref<32x256xf32, #tpu.memory_space<vmem>>, vector<32x256xf32>,
    } else {
    }
    %c0 = arith.constant 0 : index
    %c0_1 = arith.constant 0 : index
    %c0_2 = arith.constant 0 : index
    %3 = vector.load %arg2[%c0, %c0_1, %c0_2] : memref<2x32x256xf32, #tpu.memory_space<vmem>>, vector<2x32x256xf32>
    %c0_3 = arith.constant 0 : index
    %c0_4 = arith.constant 0 : index
    %4 = vector.load %arg7[%c0_3, %c0_4] : memref<32x256xf32, #tpu.memory_space<vmem>>, vector<32x256xf32>
    %5 = vector.shape_cast %4 : vector<32x256xf32> to vector<1x32x256xf32>
    %6 = vector.broadcast %5 : vector<1x32x256xf32> to vector<2x32x256xf32>
    %7 = arith.addf %3, %6 : vector<2x32x256xf32>
    %c0_5 = arith.constant 0 : index
    %c0_6 = arith.constant 0 : index
    %c0_7 = arith.constant 0 : index
    %8 = vector.load %arg6[%c0_5, %c0_6, %c0_7] : memref<2x32x256xf32, #tpu.memory_space<vmem>>, vector<2x32x256xf32>
    tpu.vector_store %arg6[%c0_5, %c0_6, %c0_7], %7 {strides = array<i32>} : memref<2x32x256xf32, #tpu.memory_space<vmem>>, vector<2x32x256xf32>,
    return
  }
  func.func @transform_0(%arg0: i32, %arg1: i32) -> (i32, i32, i32) {
    %c0_i32 = arith.constant 0 : i32
    %c0_i32_0 = arith.constant 0 : i32
    return %arg1, %c0_i32, %arg0 : i32, i32, i32
  }
  func.func @transform_1(%arg0: i32, %arg1: i32) -> (i32, i32) {
    %c0_i32 = arith.constant 0 : i32
    %c0_i32_0 = arith.constant 0 : i32
    %c0_i32_1 = arith.constant 0 : i32
    return %c0_i32, %c0_i32_0 : i32, i32
  }
  func.func @transform_2(%arg0: i32, %arg1: i32) -> (i32, i32) {
    %c0_i32 = arith.constant 0 : i32
    %c0_i32_0 = arith.constant 0 : i32
    %c0_i32_1 = arith.constant 0 : i32
    return %c0_i32, %c0_i32_0 : i32, i32
  }
  func.func @transform_3(%arg0: i32, %arg1: i32) -> (i32, i32) {
    %c0_i32 = arith.constant 0 : i32
    %c0_i32_0 = arith.constant 0 : i32
    %c0_i32_1 = arith.constant 0 : i32
    return %c0_i32, %c0_i32_0 : i32, i32
  }
  func.func @transform_4(%arg0: i32, %arg1: i32) -> (i32, i32, i32) {
    %c0_i32 = arith.constant 0 : i32
    %c0_i32_0 = arith.constant 0 : i32
    return %arg1, %c0_i32, %arg0 : i32, i32, i32
  }
}

</mosaic_0001>

<bundles_post_ra>
// kernel: soft_position_embed.1
= control target key start
LH: loop header
LB: loop body
LE: loop exit
PB: predicated region body
PF: predicated region fallthrough
CT: control target
= control target key end

     0   :  { %v342_v0 = vmov 0   ;;  %v343_v9 = vmov 1   ;;  %v344_v10 = vmov 2   ;;  %v345_v11 = vmov 3   ;;  %s542_s2 = inlined_call_operand.vmem [shape: f32[32,4], index: 2, kind: input, shape index: {}]   ;;  %s543_s3 = inlined_call_operand.vmem [shape: f32[32,1], index: 3, kind: input, shape index: {}]   ;;  %s544_s1 = inlined_call_operand.vmem [shape: f32[4,256], index: 1, kind: input, shape index: {}]   ;;  %s545_s0 = inlined_call_operand.vmem [shape: f32[2,32,256], index: 0, kind: input, shape index: {}]   ;;  %s546_s4 = inlined_call_operand.vmem [shape: f32[2,32,256], index: 4, kind: output, shape index: {}]  }
   0x1   :  { %335 = vset.pattern.permute.xlu1 %v342_v0  ;;  %334 = vset.pattern.permute.xlu0 %v342_v0  ;;  %v29_v1 = vld [vmem:[%s542_s2 + $0x10] sm:$0xff]  ;;  %v27_v2 = vld [vmem:[%s542_s2] sm:$0xff]  ;;  %v30_v3 = vld [vmem:[%s542_s2 + $0x18] sm:$0xff]  ;;  %v56_v16 = vlaneseq }
   0x2   :  { %47 = vperm.xlu1 %335, %v29_v1   ;;  %37 = vperm.xlu0 %334, %v27_v2   ;;  %v28_v4 = vld [vmem:[%s542_s2 + $0x8] sm:$0xff]  ;;  %v31_v6 = vld [vmem:[%s543_s3] sm:$0xff]  ;;  %v34_v7 = vld [vmem:[%s543_s3 + $0x18] sm:$0xff] }
   0x3   :  { %v32_v5 = vld [vmem:[%s543_s3 + $0x8] sm:$0xff]  ;;  %v33_v8 = vld [vmem:[%s543_s3 + $0x10] sm:$0xff]  ;;  %v57_v19 = vshrl.u32 %v56_v16, 7  ;;  %v26_v26 = vld [vmem:[%s544_s1] sm:$0xff] }
   0x5   :  { %v58_v22 = vsub.s32 0, %v57_v19  ;;  %v62_v23 = vsub.s32 4, %v57_v19  ;;  %v128_v24 = vsub.s32 1, %v57_v19  ;;  %v132_v25 = vsub.s32 5, %v57_v19 }
   0x6   :  { %52 = vperm.xlu1 %335, %v30_v3   ;;  %42 = vperm.xlu0 %334, %v28_v4   ;;  %v178_v27 = vsub.s32 2, %v57_v19  ;;  %v182_v28 = vsub.s32 6, %v57_v19  ;;  %v228_v35 = vsub.s32 3, %v57_v19  ;;  %v232_v36 = vsub.s32 7, %v57_v19  ;;  %v268_v19 = vld [vmem:[%s545_s0] sm:$0xff] }
   0x7   :  { %v59_v31 = vrot.slane %v26_v26, %v58_v22  ;;  %v63_v32 = vrot.slane %v26_v26, %v62_v23  ;;  %v129_v33 = vrot.slane %v26_v26, %v128_v24  ;;  %v133_v34 = vrot.slane %v26_v26, %v132_v25 }
   0x8   :  { %v179_v37 = vrot.slane %v26_v26, %v178_v27  ;;  %v183_v38 = vrot.slane %v26_v26, %v182_v28  ;;  %v229_v45 = vrot.slane %v26_v26, %v228_v35  ;;  %v233_v46 = vrot.slane %v26_v26, %v232_v36  ;;  %v277_v26 = vld [vmem:[%s545_s0 + $0x48] sm:$0xff] }
   0x9   :  { %v69_v41 = vrot.slane %v59_v31, %v58_v22  ;;  %v73_v42 = vrot.slane %v63_v32, %v58_v22  ;;  %v404_v43 = vrot.slane %v129_v33, %v128_v24  ;;  %v406_v44 = vrot.slane %v133_v34, %v128_v24 }
   0xa   :  { %89 = vperm.xlu1 %335, %v32_v5   ;;  %84 = vperm.xlu0 %334, %v31_v6   ;;  %v408_v49 = vrot.slane %v179_v37, %v178_v27  ;;  %v410_v50 = vrot.slane %v183_v38, %v178_v27  ;;  %v414_v57 = vrot.slane %v229_v45, %v228_v35 }
   0xb   :  { %v416_v58 = vrot.slane %v233_v46, %v228_v35 }
   0xe   :  { %99 = vperm.xlu1 %335, %v34_v7   ;;  %94 = vperm.xlu0 %334, %v33_v8  }
  0x12   :  { %337 = vset.pattern.permute.xlu1 %v343_v9  ;;  %336 = vset.pattern.permute.xlu0 %v343_v9 }
  0x13   :  { %115 = vperm.xlu1 %337, %v28_v4   ;;  %111 = vperm.xlu0 %336, %v27_v2  }
  0x17   :  { %119 = vperm.xlu1 %337, %v29_v1   ;;  %123 = vperm.xlu0 %336, %v30_v3  }
  0x1b   :  { %338 = vset.pattern.permute.xlu1 %v344_v10  ;;  %339 = vset.pattern.permute.xlu0 %v344_v10 }
  0x1c   :  { %161 = vperm.xlu1 %338, %v27_v2   ;;  %165 = vperm.xlu0 %339, %v28_v4  }
  0x20   :  { %169 = vperm.xlu1 %338, %v29_v1   ;;  %340 = vset.pattern.permute.xlu0 %v345_v11 }
  0x21   :  { %211 = vperm.xlu0 %340, %v27_v2  }
  0x24   :  { %173 = vperm.xlu1 %338, %v30_v3  }
  0x25   :  { %223 = vperm.xlu0 %340, %v30_v3  }
  0x28   :  { %341 = vset.pattern.permute.xlu1 %v345_v11 }
  0x29   :  { %215 = vperm.xlu1 %341, %v28_v4  }
  0x2d   :  { %219 = vperm.xlu1 %341, %v29_v1  }
  0x81   :  { %v395_v12 = vpop.permute.xlu1 %47  ;;  %v38_v13 = vpop.permute.xlu0 %37 }
  0x82   :  { %v74_v47 = vmul.f32 %v69_v41, %v38_v13  ;;  %v75_v48 = vmul.f32 %v73_v42, %v38_v13  ;;  %v78_v22 = vmul.f32 %v69_v41, %v395_v12  ;;  %v79_v23 = vmul.f32 %v73_v42, %v395_v12 }
  0x85   :  { %v53_v14 = vpop.permute.xlu1 %52  ;;  %v43_v15 = vpop.permute.xlu0 %42 }
  0x86   :  { %v76_v55 = vmul.f32 %v69_v41, %v43_v15  ;;  %v77_v56 = vmul.f32 %v73_v42, %v43_v15  ;;  %v80_v63 = vmul.f32 %v69_v41, %v53_v14  ;;  %v81_v0 = vmul.f32 %v73_v42, %v53_v14 }
  0x89   :  { %v90_v17 = vpop.permute.xlu1 %89  ;;  %v85_v18 = vpop.permute.xlu0 %84 }
  0x8a   :  { %v102_v59 = vadd.f32 %v85_v18, %v74_v47  ;;  %v103_v60 = vadd.f32 %v85_v18, %v75_v48  ;;  %v104_v8 = vadd.f32 %v90_v17, %v76_v55  ;;  %v105_v9 = vadd.f32 %v90_v17, %v77_v56  ;;  %v269_v17 = vld [vmem:[%s545_s0 + $0x8] sm:$0xff]  ;;  %v274_v47 = vld [vmem:[%s545_s0 + $0x30] sm:$0xff] }
  0x8d   :  { %v100_v20 = vpop.permute.xlu1 %99  ;;  %v397_v21 = vpop.permute.xlu0 %94 }
  0x8e   :  { %v108_v10 = vadd.f32 %v100_v20, %v80_v63  ;;  %v109_v11 = vadd.f32 %v100_v20, %v81_v0  ;;  %v276_v20 = vld [vmem:[%s545_s0 + $0x40] sm:$0xff]  ;;  %v106_v48 = vadd.f32 %v397_v21, %v78_v22  ;;  %v270_v0 = vld [vmem:[%s545_s0 + $0x10] sm:$0xff] }
  0x92   :  { %v116_v29 = vpop.permute.xlu1 %115  ;;  %v112_v30 = vpop.permute.xlu0 %111 }
  0x93   :  { %v144_v51 = vmul.f32 %v404_v43, %v112_v30  ;;  %v145_v52 = vmul.f32 %v406_v44, %v112_v30  ;;  %v146_v1 = vmul.f32 %v404_v43, %v116_v29  ;;  %v147_v2 = vmul.f32 %v406_v44, %v116_v29 }
  0x95   :  { %v152_v3 = vadd.f32 %v144_v51, %v102_v59  ;;  %v153_v4 = vadd.f32 %v145_v52, %v103_v60  ;;  %v154_v24 = vadd.f32 %v146_v1, %v104_v8  ;;  %v155_v25 = vadd.f32 %v147_v2, %v105_v9 }
  0x96   :  { %v402_v39 = vpop.permute.xlu1 %119  ;;  %v124_v40 = vpop.permute.xlu0 %123  ;;  %v107_v51 = vadd.f32 %v397_v21, %v79_v23  ;;  %v275_v21 = vld [vmem:[%s545_s0 + $0x38] sm:$0xff]  ;;  %v272_v23 = vld [vmem:[%s545_s0 + $0x20] sm:$0xff] }
  0x97   :  { %v150_v5 = vmul.f32 %v404_v43, %v124_v40  ;;  %v151_v6 = vmul.f32 %v406_v44, %v124_v40  ;;  %v148_v52 = vmul.f32 %v404_v43, %v402_v39  ;;  %v283_v43 = vld [vmem:[%s545_s0 + $0x78] sm:$0xff] }
  0x99   :  { %v158_v27 = vadd.f32 %v150_v5, %v108_v10  ;;  %v159_v28 = vadd.f32 %v151_v6, %v109_v11  ;;  %v271_v5 = vld [vmem:[%s545_s0 + $0x18] sm:$0xff]  ;;  %v156_v8 = vadd.f32 %v148_v52, %v106_v48 }
  0x9b   :  { %v162_v53 = vpop.permute.xlu1 %161  ;;  %v166_v54 = vpop.permute.xlu0 %165 }
  0x9c   :  { %v194_v61 = vmul.f32 %v408_v49, %v162_v53  ;;  %v195_v62 = vmul.f32 %v410_v50, %v162_v53  ;;  %v196_v12 = vmul.f32 %v408_v49, %v166_v54  ;;  %v197_v32 = vmul.f32 %v410_v50, %v166_v54 }
  0x9d   :  { %v149_v53 = vmul.f32 %v406_v44, %v402_v39  ;;  %v282_v39 = vld [vmem:[%s545_s0 + $0x70] sm:$0xff] }
  0x9e   :  { %v202_v15 = vadd.f32 %v194_v61, %v152_v3  ;;  %v203_v16 = vadd.f32 %v195_v62, %v153_v4  ;;  %v204_v44 = vadd.f32 %v196_v12, %v154_v24  ;;  %v205_v54 = vadd.f32 %v197_v32, %v155_v25  ;;  %v281_v24 = vld [vmem:[%s545_s0 + $0x68] sm:$0xff] }
  0x9f   :  { %v170_v7 = vpop.permute.xlu1 %169  ;;  %v157_v9 = vadd.f32 %v149_v53, %v107_v51 }
  0xa0   :  { %v212_v13 = vpop.permute.xlu0 %211  ;;  %v198_v60 = vmul.f32 %v408_v49, %v170_v7  ;;  %v199_v61 = vmul.f32 %v410_v50, %v170_v7 }
  0xa1   :  { %v244_v14 = vmul.f32 %v414_v57, %v212_v13  ;;  %v245_v18 = vmul.f32 %v416_v58, %v212_v13 }
  0xa3   :  { %v252_v29 = vadd.f32 %v244_v14, %v202_v15  ;;  %v253_v30 = vadd.f32 %v245_v18, %v203_v16  ;;  %v174_v31 = vpop.permute.xlu1 %173  ;;  %v206_v14 = vadd.f32 %v198_v60, %v156_v8  ;;  %v207_v18 = vadd.f32 %v199_v61, %v157_v9 }
  0xa4   :  { %v200_v33 = vmul.f32 %v408_v49, %v174_v31  ;;  %v201_v34 = vmul.f32 %v410_v50, %v174_v31  ;;  %v224_v35 = vpop.permute.xlu0 %223  ;;  %v278_v49 = vld [vmem:[%s545_s0 + $0x50] sm:$0xff]  ;;  %v279_v50 = vld [vmem:[%s545_s0 + $0x58] sm:$0xff] }
  0xa5   :  { %v292_v36 = vadd.f32 %v268_v19, %v252_v29  ;;  %v293_v37 = vadd.f32 %v269_v17, %v253_v30  ;;  %v300_v38 = vadd.f32 %v276_v20, %v252_v29  ;;  %v301_v40 = vadd.f32 %v277_v26, %v253_v30 }
  0xa6   :  { %v208_v41 = vadd.f32 %v200_v33, %v158_v27  ;;  %v209_v42 = vadd.f32 %v201_v34, %v159_v28  ;;  %v250_v45 = vmul.f32 %v414_v57, %v224_v35  ;;  %v251_v46 = vmul.f32 %v416_v58, %v224_v35 }
  0xa7   :  { %308 = vst [vmem:[%s546_s4] sm:$0xff] %v292_v36  ;;  %309 = vst [vmem:[%s546_s4 + $0x8] sm:$0xff] %v293_v37 }
  0xa8   :  { %316 = vst [vmem:[%s546_s4 + $0x40] sm:$0xff] %v300_v38  ;;  %317 = vst [vmem:[%s546_s4 + $0x48] sm:$0xff] %v301_v40  ;;  %v258_v55 = vadd.f32 %v250_v45, %v208_v41  ;;  %v259_v56 = vadd.f32 %v251_v46, %v209_v42  ;;  %v216_v59 = vpop.permute.xlu1 %215 }
  0xa9   :  { %v246_v62 = vmul.f32 %v414_v57, %v216_v59  ;;  %v247_v63 = vmul.f32 %v416_v58, %v216_v59 }
  0xaa   :  { %v298_v1 = vadd.f32 %v274_v47, %v258_v55  ;;  %v299_v2 = vadd.f32 %v275_v21, %v259_v56  ;;  %v306_v3 = vadd.f32 %v282_v39, %v258_v55  ;;  %v307_v4 = vadd.f32 %v283_v43, %v259_v56 }
  0xab   :  { %v254_v6 = vadd.f32 %v246_v62, %v204_v44  ;;  %v255_v7 = vadd.f32 %v247_v63, %v205_v54 }
  0xac   :  { %314 = vst [vmem:[%s546_s4 + $0x30] sm:$0xff] %v298_v1  ;;  %315 = vst [vmem:[%s546_s4 + $0x38] sm:$0xff] %v299_v2  ;;  %v220_v10 = vpop.permute.xlu1 %219 }
  0xad   :  { %322 = vst [vmem:[%s546_s4 + $0x70] sm:$0xff] %v306_v3  ;;  %323 = vst [vmem:[%s546_s4 + $0x78] sm:$0xff] %v307_v4  ;;  %v294_v11 = vadd.f32 %v270_v0, %v254_v6  ;;  %v295_v13 = vadd.f32 %v271_v5, %v255_v7  ;;  %v302_v15 = vadd.f32 %v278_v49, %v254_v6 }
  0xae   :  { %v303_v16 = vadd.f32 %v279_v50, %v255_v7  ;;  %v248_v19 = vmul.f32 %v414_v57, %v220_v10  ;;  %v249_v22 = vmul.f32 %v416_v58, %v220_v10  ;;  %v273_v57 = vld [vmem:[%s545_s0 + $0x28] sm:$0xff]  ;;  %v280_v58 = vld [vmem:[%s545_s0 + $0x60] sm:$0xff] }
  0xaf   :  { %310 = vst [vmem:[%s546_s4 + $0x10] sm:$0xff] %v294_v11  ;;  %311 = vst [vmem:[%s546_s4 + $0x18] sm:$0xff] %v295_v13 }
  0xb0   :  { %318 = vst [vmem:[%s546_s4 + $0x50] sm:$0xff] %v302_v15  ;;  %319 = vst [vmem:[%s546_s4 + $0x58] sm:$0xff] %v303_v16  ;;  %v256_v25 = vadd.f32 %v248_v19, %v206_v14  ;;  %v257_v17 = vadd.f32 %v249_v22, %v207_v18 }
  0xb2   :  { %v296_v20 = vadd.f32 %v272_v23, %v256_v25  ;;  %v297_v26 = vadd.f32 %v273_v57, %v257_v17  ;;  %v304_v27 = vadd.f32 %v280_v58, %v256_v25  ;;  %v305_v28 = vadd.f32 %v281_v24, %v257_v17 }
  0xb4   :  { %312 = vst [vmem:[%s546_s4 + $0x20] sm:$0xff] %v296_v20  ;;  %313 = vst [vmem:[%s546_s4 + $0x28] sm:$0xff] %v297_v26 }
  0xb5   :  { %320 = vst [vmem:[%s546_s4 + $0x60] sm:$0xff] %v304_v27  ;;  %321 = vst [vmem:[%s546_s4 + $0x68] sm:$0xff] %v305_v28 }

</bundles_post_ra>
